<compile_context>
chip_gen: v7x
topology: tpu7x:2x2x1
jax: 0.10.0
libtpu: 0.0.40
codegen_flags: <defaults>
</compile_context>

<pallas_src>
import jax
import jax.numpy as jnp
from jax.experimental import pallas as pl
from jax.experimental.pallas import tpu as pltpu


def _round_up(x, m):
    return (x + m - 1) // m * m


def _attention_kernel(x_ref, w_ref, o_ref):
    # x_ref: (K, tm, C)   w_ref: (1, C)   o_ref: (tm, C)
    x = x_ref[...].astype(jnp.float32)                    # (K, tm, C)
    w = w_ref[...].astype(jnp.float32)                    # (1, C)

    # Linear(C -> 1): logits[k, n] = sum_c x[k, n, c] * w[c]
    # (bias omitted: constant over K, cancels exactly in the softmax below)
    logits = jnp.sum(x * w[None, :, :], axis=-1, keepdims=True)    # (K, tm, 1)

    # softmax over K (== dim=1 of the PyTorch [N, K, C] layout)
    m = jnp.max(logits, axis=0, keepdims=True)            # (1, tm, 1)
    e = jnp.exp(logits - m)                               # (K, tm, 1)
    denom = jnp.sum(e, axis=0, keepdims=True)             # (1, tm, 1)
    r = pl.reciprocal(denom, approx=True)                 # EUP vrcp (free slot)
    r = r * (2.0 - denom * r)                             # one Newton step -> ~f32 accurate
    p = e * r                                             # (K, tm, 1) softmax weights

    # weighted sum over K
    o_ref[...] = jnp.sum(x * p, axis=0).astype(o_ref.dtype)   # (tm, C)


def _pick_tm(N, K, C_pad, itemsize, vmem_budget_bytes=24 * 1024 * 1024):
    # double-buffered input block (K, tm, C_pad) + double-buffered output (tm, C_pad)
    per_row = (2 * K + 2) * C_pad * itemsize
    tm = vmem_budget_bytes // max(per_row, 1)
    tm = min(tm, 2048, _round_up(N, 8))
    tm = max(8, (tm // 8) * 8)
    return tm


def attention_forward(stacked_knc, weight, bias=None, *, tm=None):
    """stacked_knc: [K, N, C]; weight: [C] (nn.Linear(C,1).weight flattened).

    `bias` is accepted for API parity but unused: it cancels in the softmax.
    Returns [N, C].
    """
    del bias  # constant over the softmax axis -> exactly cancels
    K, N, C = stacked_knc.shape
    out_dtype = stacked_knc.dtype
    itemsize = jnp.dtype(out_dtype).itemsize

    C_pad = _round_up(C, 128)                      # lane-dense loads/stores
    if tm is None:
        tm = _pick_tm(N, K, C_pad, itemsize)
    N_pad = _round_up(N, tm)

    x = stacked_knc
    if (N_pad != N) or (C_pad != C):
        x = jnp.pad(x, ((0, 0), (0, N_pad - N), (0, C_pad - C)))
    w2d = jnp.zeros((1, C_pad), jnp.float32).at[0, :C].set(weight.astype(jnp.float32))

    grid = (N_pad // tm,)
    buf_bytes = (2 * K + 2) * tm * C_pad * itemsize
    vmem_limit = int(min(max(3 * buf_bytes, 32 << 20), 56 << 20))  # fits v7x's 64 MiB/TC

    out = pl.pallas_call(
        _attention_kernel,
        out_shape=jax.ShapeDtypeStruct((N_pad, C_pad), out_dtype),
        grid_spec=pltpu.PrefetchScalarGridSpec(
            num_scalar_prefetch=0,
            grid=grid,
            in_specs=[
                pl.BlockSpec((K, tm, C_pad), lambda i: (0, i, 0)),
                pl.BlockSpec((1, C_pad), lambda i: (0, 0)),   # weight stays resident
            ],
            out_specs=pl.BlockSpec((tm, C_pad), lambda i: (i, 0)),
        ),
        compiler_params=pltpu.CompilerParams(
            dimension_semantics=("parallel",),
            vmem_limit_bytes=vmem_limit,
        ),
    )(x, w2d)

    return out[:N, :C]


def attention_module(inputs, weight, bias=None, *, tm=None):
    """inputs: list of [N, C] arrays (like the PyTorch `inputs` list)."""
    # Stack on axis 0 -> [K, N, C]: keeps (rows, channels) as the minor dims
    # inside the kernel block (no padded-sublane K axis, no wrapper transpose).
    stacked = jnp.stack(inputs, axis=0)
    return attention_forward(stacked, weight, bias, tm=tm)


def _reference(inputs, weight, bias):
    stacked = jnp.stack(inputs, axis=1)                       # [N, K, C]
    logits = stacked @ weight.reshape(-1, 1) + bias           # [N, K, 1]
    p = jax.nn.softmax(logits, axis=1)
    return jnp.sum(stacked * p, axis=1)


if __name__ == "__main__":
    # ---- Test 1: module-scale shapes (two "views" of node features) ----
    N, K, C = 16, 2, 32
    k1, k2, k3, k4 = jax.random.split(jax.random.PRNGKey(0), 4)
    bound = C ** -0.5
    weight = jax.random.uniform(k1, (C,), jnp.float32, -bound, bound)
    bias = jax.random.uniform(k2, (), jnp.float32, -bound, bound)
    inputs = [jax.random.normal(k3, (N, C), jnp.float32),
              jax.random.normal(k4, (N, C), jnp.float32)]

    out = jax.block_until_ready(attention_module(inputs, weight, bias))
    ref = _reference(inputs, weight, bias)
    assert out.shape == (N, C)
    assert jnp.allclose(out, ref, atol=1e-4, rtol=1e-4), "mismatch vs reference (test 1)"

    # ---- Test 2: ragged N/C + multi-step grid (exercises padding & tiling) ----
    N2, K2, C2 = 300, 3, 200
    keys = jax.random.split(jax.random.PRNGKey(1), K2 + 2)
    b2nd = C2 ** -0.5
    w2 = jax.random.uniform(keys[0], (C2,), jnp.float32, -b2nd, b2nd)
    b2 = jax.random.uniform(keys[1], (), jnp.float32, -b2nd, b2nd)
    inputs2 = [jax.random.normal(keys[2 + i], (N2, C2), jnp.float32) for i in range(K2)]

    out2 = jax.block_until_ready(attention_module(inputs2, w2, b2, tm=128))
    ref2 = _reference(inputs2, w2, b2)
    assert out2.shape == (N2, C2)
    assert jnp.allclose(out2, ref2, atol=1e-4, rtol=1e-4), "mismatch vs reference (test 2)"

    print("KERNEL_OK")
</pallas_src>

<mosaic_0001>
module attributes {stable_mosaic.version = 11 : i64} {
  func.func @_attention_kernel(%arg0: i32, %arg1: memref<2x16x128xf32, #tpu.memory_space<vmem>>, %arg2: memref<1x128xf32, #tpu.memory_space<vmem>>, %arg3: memref<16x128xf32, #tpu.memory_space<vmem>>) attributes {dimension_semantics = [#tpu.dimension_semantics<parallel>], iteration_bounds = array<i64: 1>, scalar_prefetch = 0 : i64, scratch_operands = 0 : i64, tpu.core_type = #tpu.core_type<tc>, window_params = [{transform_indices = @transform_0, window_bounds = array<i64: 2, 16, 128>}, {pipeline_mode = #tpu.pipeline_mode<synchronous>, transform_indices = @transform_1, window_bounds = array<i64: 1, 128>}, {transform_indices = @transform_2, window_bounds = array<i64: 16, 128>}]} {
    %c0 = arith.constant 0 : index
    %c0_0 = arith.constant 0 : index
    %c0_1 = arith.constant 0 : index
    %0 = vector.load %arg1[%c0, %c0_0, %c0_1] : memref<2x16x128xf32, #tpu.memory_space<vmem>>, vector<2x16x128xf32>
    %c0_2 = arith.constant 0 : index
    %c0_3 = arith.constant 0 : index
    %1 = vector.load %arg2[%c0_2, %c0_3] : memref<1x128xf32, #tpu.memory_space<vmem>>, vector<1x128xf32>
    %2 = vector.shape_cast %1 : vector<1x128xf32> to vector<1x1x128xf32>
    %3 = vector.broadcast %2 : vector<1x1x128xf32> to vector<2x16x128xf32>
    %4 = arith.mulf %0, %3 : vector<2x16x128xf32>
    %cst = arith.constant dense<0.000000e+00> : vector<2x16xf32>
    %5 = vector.multi_reduction <add>, %4, %cst [2] : vector<2x16x128xf32> to vector<2x16xf32>
    %6 = vector.shape_cast %5 : vector<2x16xf32> to vector<2x16x1xf32>
    %cst_4 = arith.constant dense<0xFF800000> : vector<16x1xf32>
    %7 = vector.multi_reduction <maximumf>, %6, %cst_4 [0] : vector<2x16x1xf32> to vector<16x1xf32>
    %8 = vector.shape_cast %7 : vector<16x1xf32> to vector<1x16x1xf32>
    %9 = vector.broadcast %8 : vector<1x16x1xf32> to vector<2x16x1xf32>
    %10 = arith.subf %6, %9 : vector<2x16x1xf32>
    %11 = math.exp %10 : vector<2x16x1xf32>
    %cst_5 = arith.constant dense<0.000000e+00> : vector<16x1xf32>
    %12 = vector.multi_reduction <add>, %11, %cst_5 [0] : vector<2x16x1xf32> to vector<16x1xf32>
    %13 = vector.shape_cast %12 : vector<16x1xf32> to vector<1x16x1xf32>
    %14 = tpu.reciprocal %13 {approx = true} : vector<1x16x1xf32> -> vector<1x16x1xf32>
    %15 = arith.mulf %13, %14 : vector<1x16x1xf32>
    %cst_6 = arith.constant 2.000000e+00 : f32
    %16 = vector.broadcast %cst_6 : f32 to vector<1x16x1xf32>
    %17 = arith.subf %16, %15 : vector<1x16x1xf32>
    %18 = arith.mulf %14, %17 : vector<1x16x1xf32>
    %19 = vector.broadcast %18 : vector<1x16x1xf32> to vector<2x16x1xf32>
    %20 = arith.mulf %11, %19 : vector<2x16x1xf32>
    %21 = vector.broadcast %20 : vector<2x16x1xf32> to vector<2x16x128xf32>
    %22 = arith.mulf %0, %21 : vector<2x16x128xf32>
    %cst_7 = arith.constant dense<0.000000e+00> : vector<16x128xf32>
    %23 = vector.multi_reduction <add>, %22, %cst_7 [0] : vector<2x16x128xf32> to vector<16x128xf32>
    %c0_8 = arith.constant 0 : index
    %c0_9 = arith.constant 0 : index
    %24 = vector.load %arg3[%c0_8, %c0_9] : memref<16x128xf32, #tpu.memory_space<vmem>>, vector<16x128xf32>
    tpu.vector_store %arg3[%c0_8, %c0_9], %23 {strides = array<i32>} : memref<16x128xf32, #tpu.memory_space<vmem>>, vector<16x128xf32>,
    return
  }
  func.func @transform_0(%arg0: i32) -> (i32, i32, i32) {
    %c0_i32 = arith.constant 0 : i32
    %c0_i32_0 = arith.constant 0 : i32
    %c0_i32_1 = arith.constant 0 : i32
    return %c0_i32, %arg0, %c0_i32_0 : i32, i32, i32
  }
  func.func @transform_1(%arg0: i32) -> (i32, i32) {
    %c0_i32 = arith.constant 0 : i32
    %c0_i32_0 = arith.constant 0 : i32
    %c0_i32_1 = arith.constant 0 : i32
    return %c0_i32, %c0_i32_0 : i32, i32
  }
  func.func @transform_2(%arg0: i32) -> (i32, i32) {
    %c0_i32 = arith.constant 0 : i32
    %c0_i32_0 = arith.constant 0 : i32
    return %arg0, %c0_i32 : i32, i32
  }
}

</mosaic_0001>

<bundles_post_ra>
// kernel: tpu_custom_call.1
= control target key start
LH: loop header
LB: loop body
LE: loop exit
PB: predicated region body
PF: predicated region fallthrough
CT: control target
= control target key end

     0   :  { %7 = vsyncpa [#allocation3], 0  ;;  %s219_s0 = inlined_call_operand.hbm [shape: f32[2,16,128], index: 0, kind: input, shape index: {}]   ;;  %s220_s1 = inlined_call_operand.vmem [shape: f32[1,128], index: 1, kind: input, shape index: {}]   ;;  %s221_s2 = inlined_call_operand.hbm [shape: f32[16,128], index: 2, kind: output, shape index: {}]  }
   0x1   :  { %8 = vsyncpa [#allocation4], 0  ;;  %s167_s9 = smov [#allocation2]   ;;  %s119_s13 = scalar_lea.hbm %s219_s0, 512 }
   0x2   :  { %s14_s10 = sshll.u32 %s167_s9, 4  ;;  %p120_p0 = scmp.ne.s32.totalorder %s219_s0, %s119_s13  ;;  %s15_s10 = int_to_ptr.vmem [resolvable:$true] %s14_s10 }
   0x3   :  { %p123_p1 = scmp.lt.u32.totalorder %s119_s13, %s219_s0 }
   0x5   :  { %p125_p2 = pnand %p123_p1, %p120_p0 }
   0x7   :  { %128 = shalt.err (!%p125_p2)
}
   0x8   :  { %s129_s18 = scalar_lea.vmem %s15_s10, 512  ;;  %p134_p4 = scmp.lt.s32.totalorder %s15_s10, %s15_s10 }
   0x9   :  { %p130_p3 = scmp.ne.s32.totalorder %s15_s10, %s129_s18  ;;  %p135_p5 = scmp.lt.s32.totalorder %s129_s18, %s129_s18 }
   0xb   :  { %p136_p6 = por %p135_p5, %p134_p4 }
   0xd   :  { %p137_p7 = pnand %p136_p6, %p130_p3 }
   0xf   :  { %140 = shalt.err (!%p137_p7)
}
  0x10   :  { %s168_s19 = smov 128   ;;  %s169_s20 = smov 8  }
  0x11   :  { %20 = dma.hbm_to_vmem [thread:$0]  %s219_s0, 512, %s15_s10, [#allocation3], %s168_s19, %s168_s19, %s169_s20  }
  0x12   :  { %163 = dma.done.wait [#allocation3], 512  }
  0x13   :  { %164 = vsyncadd [#allocation3], 4294966784  ;;  %v28_v0 = vld [vmem:[#allocation2 + $0x10] sm:$0xff]  ;;  %v102_v1 = vld [vmem:[%s220_s1] ss:$0 sm:$0xff]  ;;  %s170_s0 = smov [#allocation5]  }
  0x14   :  { %v26_v2 = vld [vmem:[#allocation2] sm:$0xff]  ;;  %v39_v3 = vmul.f32 %v102_v1, %v28_v0  ;;  %v29_v5 = vld [vmem:[#allocation2 + $0x18] sm:$0xff]  ;;  %v27_v6 = vld [vmem:[#allocation2 + $0x8] sm:$0xff]  ;;  %s90_s1 = sshll.u32 %s170_s0, 4  ;;  %s91_s1 = int_to_ptr.vmem [resolvable:$true] %s90_s1 }
  0x15   :  { %v37_v4 = vmul.f32 %v102_v1, %v26_v2  ;;  %v40_v7 = vmul.f32 %v102_v1, %v29_v5  ;;  %v38_v8 = vmul.f32 %v102_v1, %v27_v6  ;;  %s141_s25 = scalar_lea.vmem %s91_s1, 256  ;;  %p146_p9 = scmp.lt.s32.totalorder %s91_s1, %s91_s1 }
  0x16   :  { %45 = vadd.xlane.f32.xlu1 %v39_v3  ;;  %p142_p8 = scmp.ne.s32.totalorder %s91_s1, %s141_s25  ;;  %p147_p10 = scmp.lt.s32.totalorder %s141_s25, %s141_s25 }
  0x17   :  { %41 = vadd.xlane.f32.xlu0 %v37_v4 }
  0x18   :  { %p148_p11 = por %p147_p10, %p146_p9 }
  0x1a   :  { %47 = vadd.xlane.f32.xlu1 %v40_v7  ;;  %p149_p12 = pnand %p148_p11, %p142_p8 }
  0x1b   :  { %43 = vadd.xlane.f32.xlu0 %v38_v8 }
  0xa3   :  { %v46_v9 = vpop.xlane.xlu1 %45 }
  0xa4   :  { %v42_v10 = vpop.xlane.xlu0 %41 }
  0xa5   :  { %v49_v11 = vmax.f32 %v42_v10, %v46_v9 }
  0xa7   :  { %v51_v12 = vsub.f32 %v42_v10, %v49_v11  ;;  %v53_v13 = vsub.f32 %v46_v9, %v49_v11  ;;  %v48_v14 = vpop.xlane.xlu1 %47 }
  0xa8   :  { %v44_v15 = vpop.xlane.xlu0 %43 }
  0xa9   :  { %v55_v16 = vmul.f32 1.442695, %v51_v12  ;;  %v59_v17 = vmul.f32 1.442695, %v53_v13  ;;  %v50_v18 = vmax.f32 %v44_v15, %v48_v14 }
  0xab   :  { %107 = vpow2.f32 %v55_v16  ;;  %v52_v19 = vsub.f32 %v44_v15, %v50_v18  ;;  %v54_v20 = vsub.f32 %v48_v14, %v50_v18 }
  0xac   :  { %109 = vpow2.f32 %v59_v17 }
  0xad   :  { %v57_v21 = vmul.f32 1.442695, %v52_v19  ;;  %v61_v22 = vmul.f32 1.442695, %v54_v20 }
  0xaf   :  { %111 = vpow2.f32 %v57_v21 }
  0xb0   :  { %113 = vpow2.f32 %v61_v22 }
  0xb5   :  { %v108_v23 = vpop.eup %107 }
  0xb6   :  { %v110_v24 = vpop.eup %109 }
  0xb7   :  { %v63_v25 = vadd.f32 %v110_v24, %v108_v23 }
  0xb9   :  { %v112_v26 = vpop.eup %111  ;;  %115 = vrcp.f32 %v63_v25 }
  0xba   :  { %v114_v27 = vpop.eup %113 }
  0xbb   :  { %v64_v28 = vadd.f32 %v114_v27, %v112_v26 }
  0xbd   :  { %117 = vrcp.f32 %v64_v28 }
  0xc3   :  { %v116_v29 = vpop.eup %115 }
  0xc4   :  { %v67_v30 = vmul.f32 %v116_v29, %v63_v25 }
  0xc6   :  { %v69_v31 = vsub.f32 2.0, %v67_v30 }
  0xc7   :  { %v118_v32 = vpop.eup %117 }
  0xc8   :  { %v68_v33 = vmul.f32 %v118_v32, %v64_v28  ;;  %v71_v34 = vmul.f32 %v116_v29, %v69_v31 }
  0xca   :  { %v70_v35 = vsub.f32 2.0, %v68_v33  ;;  %v73_v36 = vmul.f32 %v108_v23, %v71_v34  ;;  %v75_v37 = vmul.f32 %v110_v24, %v71_v34 }
  0xcc   :  { %v72_v38 = vmul.f32 %v118_v32, %v70_v35  ;;  %v77_v39 = vmul.f32 %v73_v36, %v26_v2  ;;  %v79_v40 = vmul.f32 %v75_v37, %v28_v0 }
  0xce   :  { %v74_v41 = vmul.f32 %v112_v26, %v72_v38  ;;  %v76_v42 = vmul.f32 %v114_v27, %v72_v38  ;;  %v81_v43 = vadd.f32 %v79_v40, %v77_v39 }
  0xd0   :  { %v78_v44 = vmul.f32 %v74_v41, %v27_v6  ;;  %v80_v45 = vmul.f32 %v76_v42, %v29_v5  ;;  %83 = vst [vmem:[#allocation5] sm:$0xff] %v81_v43 }
  0xd2   :  { %v82_v46 = vadd.f32 %v80_v45, %v78_v44 }
  0xd4   :  { %84 = vst [vmem:[#allocation5 + $0x8] sm:$0xff] %v82_v46 }
  0xd5   :  { %152 = shalt.err (!%p149_p12)
}
  0xd6   :  { %s153_s28 = scalar_lea.hbm %s221_s2, 256 }
  0xd7   :  { %p154_p13 = scmp.ne.s32.totalorder %s221_s2, %s153_s28  ;;  %p157_p0 = scmp.lt.u32.totalorder %s153_s28, %s221_s2 }
  0xd9   :  { %p159_p1 = pnand %p157_p0, %p154_p13 }
  0xdb   :  { %162 = shalt.err (!%p159_p1)
}
  0xdc   :  { %96 = dma.vmem_to_hbm [thread:$0]  %s91_s1, 256, %s221_s2, [#allocation4], %s168_s19, %s168_s19, %s169_s20  }
  0xdd   :  { %165 = dma.done.wait [#allocation4], 256  }
  0xde   :  { %166 = vsyncadd [#allocation4], 4294967040 }
  0xdf   :  { %100 = vsyncpa [#allocation3], 1 }
  0xe0   :  { %101 = vsyncpa [#allocation4], 1 }

</bundles_post_ra>
